<compile_context>
chip_gen: v5e
topology: v5e:2x2
jax: 0.10.0
libtpu: 0.0.40
codegen_flags: <defaults>
</compile_context>

<pallas_src>
import functools

import jax
import jax.numpy as jnp
from jax import lax
from jax.experimental import pallas as pl
from jax.experimental.pallas import tpu as pltpu


def _vmem_capacity_bytes():
    """Best-effort per-generation VMEM capacity; conservative (v7x) fallback."""
    try:
        info = pltpu.get_tpu_info()
        for attr in ("vmem_capacity_bytes", "vmem_bytes", "vmem_size_bytes"):
            v = getattr(info, attr, None)
            if v:
                return int(v)
    except Exception:
        pass
    return 64 * 1024 * 1024


def _pick_tile_b(batch, cp, n_pad, vmem_cap):
    """Batch elements per grid step: amortize step overhead, fit VMEM, keep
    >= 2 grid steps so v7x's two TensorCores both get work."""
    per_elt_block = cp * n_pad * (4 + 4) * 2            # f32 in + out, double-buffered
    temporaries = 12 * cp * n_pad * 4 + 3 * cp * cp * 4  # per-batch in-loop temps
    budget = int(0.5 * vmem_cap)
    by_vmem = max(1, (budget - temporaries) // max(per_elt_block, 1))
    by_grid = max(1, -(-batch // 2))                     # ceil(batch/2)
    by_step = max(1, (2 * 1024 * 1024) // max(cp * n_pad * 8, 1))
    return int(max(1, min(by_vmem, by_grid, by_step, batch, 8)))


def _selfattn_kernel(x_ref, w_ref, b_ref, o_ref, *, n_valid, c_valid, cp, tile_b):
    # x_ref: (tile_b, Cp, Np) f32, w_ref: (3Cp, Cp) bf16, b_ref: (3Cp, 1) f32,
    # o_ref: (tile_b, Cp, Np) out_dtype
    w = w_ref[...]                                  # (3Cp, Cp) bf16
    bias = b_ref[...]                               # (3Cp, 1) f32
    n_pad = x_ref.shape[-1]

    # Static unroll over the small batch tile (tile_b <= 8).
    for bi in range(tile_b):
        x = x_ref[bi]                               # (Cp, Np) f32 -- kept for residual
        xb = x.astype(jnp.bfloat16)

        # Fused theta/phi/g 1x1-conv projection: one MXU matmul, f32 accumulate.
        proj = jnp.dot(w, xb, preferred_element_type=jnp.float32) + bias  # (3Cp, Np)

        # Cp is a multiple of 8 -> these row slices are tile-aligned views.
        theta = proj[0:cp]
        phi = proj[cp:2 * cp]
        g_y = proj[2 * cp:3 * cp]

        # Mask padded spatial columns out of the spatial softmax.
        if n_valid != n_pad:
            lane = lax.broadcasted_iota(jnp.int32, theta.shape, 1)
            theta = jnp.where(lane < n_valid, theta, -jnp.inf)

        # softmax over the spatial axis (dim=-1) for theta
        t_max = jnp.max(theta, axis=-1, keepdims=True)
        t_exp = jnp.exp(theta - t_max)
        theta_soft = t_exp * pl.reciprocal(
            jnp.sum(t_exp, axis=-1, keepdims=True), approx=True)

        # softmax over the channel axis (dim=1 in the PyTorch view) for g;
        # padded channel rows must not contribute to the denominator.
        if c_valid != cp:
            row = lax.broadcasted_iota(jnp.int32, g_y.shape, 0)
            g_y = jnp.where(row < c_valid, g_y, -jnp.inf)
        g_max = jnp.max(g_y, axis=0, keepdims=True)
        g_exp = jnp.exp(g_y - g_max)
        g_soft = g_exp * pl.reciprocal(
            jnp.sum(g_exp, axis=0, keepdims=True), approx=True)

        # similarity = phi (Cp,Np) @ theta_soft^T (Np,Cp) -> (Cp, Cp)
        sim = lax.dot_general(
            phi.astype(jnp.bfloat16), theta_soft.astype(jnp.bfloat16),
            (((1,), (1,)), ((), ())), preferred_element_type=jnp.float32)

        # attention = similarity (Cp,Cp) @ g_soft (Cp,Np) -> (Cp, Np)
        attn = jnp.dot(sim.astype(jnp.bfloat16), g_soft.astype(jnp.bfloat16),
                       preferred_element_type=jnp.float32)

        # residual add on the exact f32 activations + LeakyReLU(0.1)
        z = x + attn
        o_ref[bi] = jnp.where(z >= 0, z, 0.1 * z).astype(o_ref.dtype)


def selfattention_forward(x_nchw, wg, bg, wt, bt, wp, bp, *, out_dtype=jnp.float32):
    b, c, h, w = x_nchw.shape
    n = h * w

    lane_mult = 256                       # matches v6e/v7x 2x256 MXU tiles
    n_pad = pl.cdiv(n, lane_mult) * lane_mult
    cp = max(8, pl.cdiv(c, 8) * 8)        # sublane-aligned channel dim

    x = x_nchw.reshape(b, c, n).astype(jnp.float32)
    x = jnp.pad(x, ((0, 0), (0, cp - c), (0, n_pad - n)))

    def pad_w(m):
        return jnp.pad(m.astype(jnp.float32), ((0, cp - c), (0, cp - c)))

    def pad_b(v):
        return jnp.pad(v.astype(jnp.float32), ((0, cp - c),))

    # Stacked projection weights / biases, order [theta; phi; g]; each block is
    # padded to Cp rows so the in-kernel slices are tile-aligned.
    w_stack = jnp.concatenate(
        [pad_w(wt), pad_w(wp), pad_w(wg)], axis=0).astype(jnp.bfloat16)   # (3Cp, Cp)
    b_stack = jnp.concatenate(
        [pad_b(bt), pad_b(bp), pad_b(bg)], axis=0).reshape(3 * cp, 1)     # (3Cp, 1) f32

    vmem_cap = _vmem_capacity_bytes()
    tile_b = _pick_tile_b(b, cp, n_pad, vmem_cap)
    b_pad = pl.cdiv(b, tile_b) * tile_b
    if b_pad != b:
        x = jnp.pad(x, ((0, b_pad - b), (0, 0), (0, 0)))
    grid = (b_pad // tile_b,)

    out_itemsize = jnp.dtype(out_dtype).itemsize
    block_bytes = tile_b * cp * n_pad * (4 + out_itemsize)
    param_bytes = 3 * cp * cp * 2 + 3 * cp * 4
    temp_bytes = 12 * cp * n_pad * 4 + 3 * cp * cp * 4
    vmem_est = 2 * block_bytes + 2 * param_bytes + temp_bytes
    vmem_limit = int(min(int(0.85 * vmem_cap),
                         max(2 * vmem_est, 8 * 1024 * 1024)))

    cost = pl.CostEstimate(
        flops=int(b_pad * 10 * cp * cp * n_pad),
        transcendentals=int(b_pad * 2 * cp * n_pad),
        bytes_accessed=int(b_pad * cp * n_pad * (4 + out_itemsize) + param_bytes),
    )

    kernel = functools.partial(_selfattn_kernel, n_valid=n, c_valid=c,
                               cp=cp, tile_b=tile_b)
    full2d = lambda i: (0, 0)

    out = pl.pallas_call(
        kernel,
        out_shape=jax.ShapeDtypeStruct((b_pad, cp, n_pad), out_dtype),
        grid=grid,
        in_specs=[
            pl.BlockSpec((tile_b, cp, n_pad), lambda i: (i, 0, 0)),  # x (f32)
            pl.BlockSpec((3 * cp, cp), full2d),                      # stacked weights
            pl.BlockSpec((3 * cp, 1), full2d),                       # stacked biases
        ],
        out_specs=pl.BlockSpec((tile_b, cp, n_pad), lambda i: (i, 0, 0)),
        compiler_params=pltpu.CompilerParams(
            dimension_semantics=("parallel",),
            vmem_limit_bytes=vmem_limit),
        cost_estimate=cost,
    )(x, w_stack, b_stack)

    out = out[:b, :c, :n]
    return out.reshape(b, c, h, w)


def _reference_forward(x, wg, bg, wt, bt, wp, bp):
    # Pure-JAX f32 reference mirroring the PyTorch forward.
    b, c, h, w = x.shape
    n = h * w
    xf = x.reshape(b, c, n)
    conv = lambda W, bias: jnp.einsum('oc,bcn->bon', W, xf) + bias[None, :, None]
    g_y = conv(wg, bg)
    theta = jax.nn.softmax(conv(wt, bt), axis=-1)
    phi = conv(wp, bp)
    sim = jnp.einsum('bcn,bdn->bcd', phi, theta)            # bmm(phi, theta^T)
    g_soft = jax.nn.softmax(g_y, axis=1)
    attn = jnp.einsum('bcd,bdn->bcn', sim, g_soft).reshape(b, c, h, w)
    z = x + attn
    return jnp.where(z >= 0, z, 0.1 * z)


if __name__ == "__main__":
    B, C, H, W = 2, 4, 16, 16
    key = jax.random.PRNGKey(0)
    kx, k1, k2, k3, k4, k5, k6 = jax.random.split(key, 7)

    x = jax.random.normal(kx, (B, C, H, W), dtype=jnp.float32)

    # Deterministic conv 1x1 parameter init (PyTorch-style uniform bound).
    bound = 1.0 / jnp.sqrt(jnp.float32(C))
    wg = jax.random.uniform(k1, (C, C), jnp.float32, -bound, bound)
    bg = jax.random.uniform(k2, (C,), jnp.float32, -bound, bound)
    wt = jax.random.uniform(k3, (C, C), jnp.float32, -bound, bound)
    bt = jax.random.uniform(k4, (C,), jnp.float32, -bound, bound)
    wp = jax.random.uniform(k5, (C, C), jnp.float32, -bound, bound)
    bp = jax.random.uniform(k6, (C,), jnp.float32, -bound, bound)

    y = selfattention_forward(x, wg, bg, wt, bt, wp, bp)
    jax.block_until_ready(y)

    y_ref = _reference_forward(x, wg, bg, wt, bt, wp, bp)
    assert y.shape == (B, C, H, W)
    # Tolerance relaxed vs the pure-f32 reference: matmul operands are bf16
    # (f32 accumulation) and softmax reciprocals use the approx EUP path; the
    # residual path itself is exact f32.
    assert jnp.allclose(y, y_ref, atol=5e-2, rtol=5e-2), "mismatch vs reference"

    print("KERNEL_OK")
</pallas_src>

<mosaic_0001>
module attributes {stable_mosaic.version = 11 : i64} {
  func.func @_selfattn_kernel(%arg0: i32, %arg1: memref<1x8x256xf32, #tpu.memory_space<vmem>>, %arg2: memref<24x8xbf16, #tpu.memory_space<vmem>>, %arg3: memref<24x1xf32, #tpu.memory_space<vmem>>, %arg4: memref<1x8x256xf32, #tpu.memory_space<vmem>>) attributes {dimension_semantics = [#tpu.dimension_semantics<parallel>], iteration_bounds = array<i64: 2>, scalar_prefetch = 0 : i64, scratch_operands = 0 : i64, tpu.core_type = #tpu.core_type<tc>, window_params = [{transform_indices = @transform_0, window_bounds = array<i64: 1, 8, 256>}, {pipeline_mode = #tpu.pipeline_mode<synchronous>, transform_indices = @transform_1, window_bounds = array<i64: 24, 8>}, {pipeline_mode = #tpu.pipeline_mode<synchronous>, transform_indices = @transform_2, window_bounds = array<i64: 24, 1>}, {transform_indices = @transform_3, window_bounds = array<i64: 1, 8, 256>}]} {
    %c0 = arith.constant 0 : index
    %c0_0 = arith.constant 0 : index
    %0 = vector.load %arg2[%c0, %c0_0] : memref<24x8xbf16, #tpu.memory_space<vmem>>, vector<24x8xbf16>
    %c0_1 = arith.constant 0 : index
    %c0_2 = arith.constant 0 : index
    %1 = vector.load %arg3[%c0_1, %c0_2] : memref<24x1xf32, #tpu.memory_space<vmem>>, vector<24x1xf32>
    %c0_3 = arith.constant 0 : index
    %c0_4 = arith.constant 0 : index
    %c0_5 = arith.constant 0 : index
    %2 = vector.load %arg1[%c0_3, %c0_4, %c0_5] : memref<1x8x256xf32, #tpu.memory_space<vmem>>, vector<1x8x256xf32>
    %3 = vector.shape_cast %2 : vector<1x8x256xf32> to vector<8x256xf32>
    %4 = arith.truncf %3 : vector<8x256xf32> to vector<8x256xbf16>
    %cst = arith.constant dense<0.000000e+00> : vector<24x256xf32>
    %5 = tpu.matmul %0, %4, %cst {dimension_numbers = #tpu.dot_dimension_numbers<[1], [0], [0], [1], [0, 0, 1, 1], [], []>} : vector<24x8xbf16>, vector<8x256xbf16>, vector<24x256xf32> -> vector<24x256xf32>
    %6 = vector.broadcast %1 : vector<24x1xf32> to vector<24x256xf32>
    %7 = arith.addf %5, %6 : vector<24x256xf32>
    %8 = vector.extract_strided_slice %7 {offsets = [0, 0], sizes = [8, 256], strides = [1, 1]} : vector<24x256xf32> to vector<8x256xf32>
    %9 = vector.extract_strided_slice %7 {offsets = [8, 0], sizes = [8, 256], strides = [1, 1]} : vector<24x256xf32> to vector<8x256xf32>
    %10 = vector.extract_strided_slice %7 {offsets = [16, 0], sizes = [8, 256], strides = [1, 1]} : vector<24x256xf32> to vector<8x256xf32>
    %cst_6 = arith.constant dense<0xFF800000> : vector<8xf32>
    %11 = vector.multi_reduction <maximumf>, %8, %cst_6 [1] : vector<8x256xf32> to vector<8xf32>
    %12 = vector.shape_cast %11 : vector<8xf32> to vector<8x1xf32>
    %13 = vector.broadcast %12 : vector<8x1xf32> to vector<8x256xf32>
    %14 = arith.subf %8, %13 : vector<8x256xf32>
    %15 = math.exp %14 : vector<8x256xf32>
    %cst_7 = arith.constant dense<0.000000e+00> : vector<8xf32>
    %16 = vector.multi_reduction <add>, %15, %cst_7 [1] : vector<8x256xf32> to vector<8xf32>
    %17 = vector.shape_cast %16 : vector<8xf32> to vector<8x1xf32>
    %18 = tpu.reciprocal %17 {approx = true} : vector<8x1xf32> -> vector<8x1xf32>
    %19 = vector.broadcast %18 : vector<8x1xf32> to vector<8x256xf32>
    %20 = arith.mulf %15, %19 : vector<8x256xf32>
    %21 = tpu.iota {dimensions = array<i32: 0>} : vector<8x256xi32>
    %c4_i32 = arith.constant 4 : i32
    %22 = vector.broadcast %c4_i32 : i32 to vector<8x256xi32>
    %23 = arith.cmpi slt, %21, %22 : vector<8x256xi32>
    %cst_8 = arith.constant 0xFF800000 : f32
    %24 = vector.broadcast %cst_8 : f32 to vector<8x256xf32>
    %25 = arith.select %23, %10, %24 : vector<8x256xi1>, vector<8x256xf32>
    %cst_9 = arith.constant dense<0xFF800000> : vector<256xf32>
    %26 = vector.multi_reduction <maximumf>, %25, %cst_9 [0] : vector<8x256xf32> to vector<256xf32>
    %27 = vector.shape_cast %26 : vector<256xf32> to vector<1x256xf32>
    %28 = vector.broadcast %27 : vector<1x256xf32> to vector<8x256xf32>
    %29 = arith.subf %25, %28 : vector<8x256xf32>
    %30 = math.exp %29 : vector<8x256xf32>
    %cst_10 = arith.constant dense<0.000000e+00> : vector<256xf32>
    %31 = vector.multi_reduction <add>, %30, %cst_10 [0] : vector<8x256xf32> to vector<256xf32>
    %32 = vector.shape_cast %31 : vector<256xf32> to vector<1x256xf32>
    %33 = tpu.reciprocal %32 {approx = true} : vector<1x256xf32> -> vector<1x256xf32>
    %34 = vector.broadcast %33 : vector<1x256xf32> to vector<8x256xf32>
    %35 = arith.mulf %30, %34 : vector<8x256xf32>
    %36 = arith.truncf %9 : vector<8x256xf32> to vector<8x256xbf16>
    %37 = arith.truncf %20 : vector<8x256xf32> to vector<8x256xbf16>
    %cst_11 = arith.constant dense<0.000000e+00> : vector<8x8xf32>
    %38 = tpu.matmul %36, %37, %cst_11 {dimension_numbers = #tpu.dot_dimension_numbers<[1], [1], [0], [0], [0, 0, 1, 0], [], []>} : vector<8x256xbf16>, vector<8x256xbf16>, vector<8x8xf32> -> vector<8x8xf32>
    %39 = arith.truncf %38 : vector<8x8xf32> to vector<8x8xbf16>
    %40 = arith.truncf %35 : vector<8x256xf32> to vector<8x256xbf16>
    %cst_12 = arith.constant dense<0.000000e+00> : vector<8x256xf32>
    %41 = tpu.matmul %39, %40, %cst_12 {dimension_numbers = #tpu.dot_dimension_numbers<[1], [0], [0], [1], [0, 0, 1, 1], [], []>} : vector<8x8xbf16>, vector<8x256xbf16>, vector<8x256xf32> -> vector<8x256xf32>
    %42 = arith.addf %3, %41 : vector<8x256xf32>
    %cst_13 = arith.constant 0.000000e+00 : f32
    %43 = vector.broadcast %cst_13 : f32 to vector<8x256xf32>
    %44 = arith.cmpf oge, %42, %43 : vector<8x256xf32>
    %cst_14 = arith.constant 1.000000e-01 : f32
    %45 = vector.broadcast %cst_14 : f32 to vector<8x256xf32>
    %46 = arith.mulf %45, %42 : vector<8x256xf32>
    %47 = arith.select %44, %42, %46 : vector<8x256xi1>, vector<8x256xf32>
    %c0_15 = arith.constant 0 : index
    %c0_16 = arith.constant 0 : index
    %c0_17 = arith.constant 0 : index
    %48 = vector.load %arg4[%c0_15, %c0_16, %c0_17] : memref<1x8x256xf32, #tpu.memory_space<vmem>>, vector<1x8x256xf32>
    %49 = vector.shape_cast %48 : vector<1x8x256xf32> to vector<8x256xf32>
    %50 = vector.shape_cast %47 : vector<8x256xf32> to vector<1x8x256xf32>
    tpu.vector_store %arg4[%c0_15, %c0_16, %c0_17], %50 {strides = array<i32>} : memref<1x8x256xf32, #tpu.memory_space<vmem>>, vector<1x8x256xf32>,
    return
  }
  func.func @transform_0(%arg0: i32) -> (i32, i32, i32) {
    %c0_i32 = arith.constant 0 : i32
    %c0_i32_0 = arith.constant 0 : i32
    %c0_i32_1 = arith.constant 0 : i32
    return %arg0, %c0_i32, %c0_i32_0 : i32, i32, i32
  }
  func.func @transform_1(%arg0: i32) -> (i32, i32) {
    %c0_i32 = arith.constant 0 : i32
    %c0_i32_0 = arith.constant 0 : i32
    %c0_i32_1 = arith.constant 0 : i32
    return %c0_i32, %c0_i32_0 : i32, i32
  }
  func.func @transform_2(%arg0: i32) -> (i32, i32) {
    %c0_i32 = arith.constant 0 : i32
    %c0_i32_0 = arith.constant 0 : i32
    %c0_i32_1 = arith.constant 0 : i32
    return %c0_i32, %c0_i32_0 : i32, i32
  }
  func.func @transform_3(%arg0: i32) -> (i32, i32, i32) {
    %c0_i32 = arith.constant 0 : i32
    %c0_i32_0 = arith.constant 0 : i32
    %c0_i32_1 = arith.constant 0 : i32
    return %arg0, %c0_i32, %c0_i32_0 : i32, i32, i32
  }
}

</mosaic_0001>

<bundles_post_ra>
// kernel: tpu_custom_call.1
= control target key start
LH: loop header
LB: loop body
LE: loop exit
PB: predicated region body
PF: predicated region fallthrough
CT: control target
= control target key end

     0   :  { %8 = vsyncpa [#allocation3], 0  ;;  %s748_s0 = inlined_call_operand.vmem [shape: f32[2,8,256], index: 0, kind: input, shape index: {}]   ;;  %s749_s1 = inlined_call_operand.vmem [shape: bf16[24,8], index: 1, kind: input, shape index: {}]   ;;  %s750_s2 = inlined_call_operand.vmem [shape: f32[24,1], index: 2, kind: input, shape index: {}]   ;;  %s751_s3 = inlined_call_operand.hbm [shape: f32[2,8,256], index: 3, kind: output, shape index: {}]  }
   0x1   :  { %10 = vsyncpa [#allocation3 + $0x1], 0  ;;  %s628_s12 = smov 0   ;;  %s630_s13 = smov 0  }
   0x2   :  { %s632_s14 = smov 0   ;;  %s634_s15 = smov 0  }
   0x3 LB: > { %s649_s16 = sadd.s32 4294967295, %s605_s15   ;;  %s461_s17 = sadd.s32 4294967294, %s605_s15   ;;  %s605_s15 = sphi %s634_s15, %s757_s15   ;;  %s601_s14 = sphi %s632_s14, %s756_s14   ;;  %s597_s13 = sphi %s630_s13, %s755_s13   ;;  %s593_s12 = sphi %s628_s12, %s754_s12  }
   0x4   : > { %s653_s18 = sadd.s32 1, %s605_s15   ;;  %s91_s19 = sadd.s32 1, %s601_s14 }
   0x5   : > { %s88_s20 = ssub.s32 %s605_s15, %s653_s18  ;;  %p101_p0 = scmp.ne.s32.totalorder %s601_s14, %s597_s13 }
   0x6   : > { %p89_p1 = scmp.eq.s32.totalorder %s88_s20, 0  ;;  %p102_p2 = scmp.eq.s32.totalorder %s649_s16, 1 }
   0x7   : > { %p107_p3 = scmp.ne.s32.totalorder %s597_s13, %s593_s12  ;;  %p108_p4 = scmp.eq.s32.totalorder %s461_s17, 1 }
   0x8   : > { %s664_s21 = scalar_select %p89_p1, %s601_s14, %s91_s19  }
   0x9   : > { %p666_p5 = por %p102_p2, %p101_p0  ;;  %p670_p6 = por %p108_p4, %p107_p3 }
   0xa   : > { %p464_p7 = scmp.ge.s32.totalorder %s605_s15, 1  ;;  %p140_p8 = scmp.lt.s32.totalorder %s605_s15, 3 }
   0xc   : > { %p141_p9 = pnand %p464_p7, %p140_p8 }
   0xd   : > { %p164_p10 = scmp.lt.s32.totalorder (!%p141_p9), %s649_s16, 1  ;;  %s161_s17 = sand.u32 (!%p141_p9), 1, %s597_s13  }
   0xe   : > { %144 = sbr.rel (%p141_p9) target bundleno = 712 (0x2c8), region = 32  ;;  %s465_s19 = sshll.u32 (!%p141_p9), %s161_s17, 4 }
   0xf   : > { %s485_s20 = sshll.u32 (!%p141_p9), %s649_s16, 4  ;;  %s563_s7 = scalar_lea.hbm (!%p141_p9), %s751_s3, 32 }
  0x13   : > { %v173_v0 = vld [vmem:[%s750_s2] sm:$0xff]  ;;  %v607_v1 = vmov 0   ;;  %s165_s26 = scalar_select %p164_p10, %s649_s16, 1  ;;  %vm210_vm0 = vcmask 1043456   ;;  %vm203_vm1 = vcmask 64512   ;;  %v175_v21 = vld [vmem:[%s750_s2 + $0x10] sm:$0xff]  ;;  %v268_v31 = vlaneseq }
  0x14   : > { %526 = vset.pattern.permute.xlu0 %v607_v1  ;;  %527 = vset.pattern.permute.xlu1 %v607_v1  ;;  %v484_v8 = vld [vmem:[%s749_s1] sm:$0xff]  ;;  %v172_v20 = vld [vmem:[%s749_s1 + $0x8] sm:$0xf]  ;;  %s386_s16 = scalar_lea.sflag [#allocation3], %s161_s17 }
  0x15   : > { %182 = vperm.xlu0 %526, %v173_v0   ;;  %528 = vset.pattern.permute.xlu2 %v607_v1  ;;  %s483_s27 = sshll.u32 %s165_s26, 4  ;;  %v200_v22 = vunpack.c.l.b16 %v172_v20  ;;  %v174_v27 = vld [vmem:[%s750_s2 + $0x8] sm:$0xff]  ;;  %v269_v32 = vshrl.u32 %v268_v31, 7  ;;  %s397_s26 = scalar_lea.hbm %s751_s3, %s485_s20 }
  0x16   : > { %s168_s30 = scalar_lea.vmem %s748_s0, %s483_s27  ;;  %192 = vperm.xlu2 %528, %v175_v21   ;;  %s163_s27 = scalar_lea.vmem [#allocation2], %s465_s19 }
  0x17   : > { %v684_v2 = vld [vmem:[%s168_s30] sm:$0xff]  ;;  %v686_v3 = vld [vmem:[%s168_s30 + $0x8] sm:$0xff]  ;;  %v202_v24 = vpack.c.b16 %v200_v22, %v200_v22  ;;  %vm270_vm2 = vcmp.lt.s32.totalorder %v269_v32, 4  ;;  %s399_s28 = sshll.u32 %s163_s27, 4  ;;  %s401_s29 = sshll.u32 %s397_s26, 4  ;;  %s400_s28 = int_to_ptr.vmem [resolvable:$true] %s399_s28  ;;  %s402_s29 = int_to_ptr.hbm [resolvable:$true] %s401_s29 }
  0x18   : > { %v178_v4 = vpack.c.bf16 %v684_v2, %v684_v2  ;;  %v179_v5 = vpack.c.bf16 %v686_v3, %v686_v3  ;;  %s557_s30 = sshra.s32 %s402_s29, 4  ;;  %s558_s30 = int_to_ptr.hbm [resolvable:$true] %s557_s30 }
  0x19   : > { %s559_s4 = scalar_lea.hbm %s558_s30, 16  ;;  %p564_p0 = scmp.lt.s32.totalorder %s558_s30, %s751_s3 }
  0x1a   : > { %v212_v6 = vsel %vm210_vm0, %v178_v4, 0  ;;  %v215_v7 = vsel %vm210_vm0, %v179_v5, 0  ;;  %p560_p11 = scmp.ne.s32.totalorder %s558_s30, %s559_s4  ;;  %p565_p1 = scmp.lt.s32.totalorder %s563_s7, %s559_s4 }
  0x1b   : > { %224 = vmatpush.bf16.msra.mxu0 %v212_v6  ;;  %242 = vmatpush.bf16.msra.mxu1 %v215_v7 }
  0x1c   : > { %p561_p12 = pnand %p560_p11, %p666_p5  ;;  %p566_p2 = por %p565_p1, %p564_p0 }
  0x1e   : > { %472 = vmatmul.msk.bf16.vlgmr.msra.gmra.mxu0 %vm203_vm1, %v484_v8  ;;  %474 = vmatmul.msk.bf16.vlgmr.msra.gmra.mxu1 %vm203_vm1, %v484_v8  ;;  %p562_p13 = pneg %p561_p12 }
  0x20   : > { %p567_p3 = pnand %p566_p2, %p562_p13 }
  0x2e   : > { %473 = vmatmul.msk.bf16.gmra.mxu0 %vm203_vm1, %v202_v24  ;;  %475 = vmatmul.msk.bf16.gmra.mxu1 %vm203_vm1, %v202_v24 }
  0x70   : > { %v193_v33 = vpop.permute.xlu2 %192 }
  0x87   : > { %v183_v9 = vpop.permute.xlu0 %182 }
  0x9b   : > { %v226_v10 = vpop.f32.mrf.mxu0  ;;  %v244_v11 = vpop.f32.mrf.mxu1 }
  0x9c   : > { %v227_v12 = vadd.f32 %v226_v10, %v183_v9  ;;  %v245_v13 = vadd.f32 %v244_v11, %v183_v9 }
  0x9e   : > { %v253_v14 = vmax.f32 %v227_v12, %v245_v13 }
  0xa0   : > { %254 = vmax.xlane.f32.xlu0 %v253_v14 }
  0xa3   : > { %v228_v28 = vpop.f32.mrf.mxu0  ;;  %v246_v29 = vpop.f32.mrf.mxu1 }
  0xab   : > { %v231_v37 = vpop.f32.mrf.mxu0  ;;  %v249_v38 = vpop.f32.mrf.mxu1 }
  0xac   : > { %v232_v39 = vadd.f32 %v231_v37, %v193_v33  ;;  %v250_v40 = vadd.f32 %v249_v38, %v193_v33 }
  0xae   : > { %v271_v43 = vsel %vm270_vm2, %v232_v39, -inf  ;;  %v272_v44 = vsel %vm270_vm2, %v250_v40, -inf }
  0xaf   : > { %v273_v45 = vrot.slane %v271_v43, 4  ;;  %v279_v46 = vrot.slane %v272_v44, 4 }
  0xb1   : > { %v274_v47 = vmax.f32 %v271_v43, %v273_v45  ;;  %v280_v48 = vmax.f32 %v272_v44, %v279_v46 }
  0xb3   : > { %v275_v49 = vrot.slane %v274_v47, 2  ;;  %v281_v50 = vrot.slane %v280_v48, 2  ;;  %v233_v51 = vpop.f32.mrf.mxu0  ;;  %v251_v52 = vpop.f32.mrf.mxu1 }
  0xb5   : > { %v276_v53 = vmax.f32 %v274_v47, %v275_v49  ;;  %v282_v54 = vmax.f32 %v280_v48, %v281_v50 }
  0xb7   : > { %v277_v55 = vrot.slane %v276_v53, 1  ;;  %v283_v56 = vrot.slane %v282_v54, 1 }
  0xb9   : > { %v278_v57 = vmax.f32 %v276_v53, %v277_v55  ;;  %v284_v58 = vmax.f32 %v282_v54, %v283_v56 }
  0xbb   : > { %v285_v60 = vsub.f32 %v271_v43, %v278_v57  ;;  %v286_v61 = vsub.f32 %v272_v44, %v284_v58 }
  0xbd   : > { %v287_v0 = vmul.f32 1.442695, %v285_v60  ;;  %v289_v1 = vmul.f32 1.442695, %v286_v61 }
 0x113   : > { %v255_v15 = vpop.xlane.xlu0 %254 }
 0x114   : > { %v256_v16 = vsub.f32 %v227_v12, %v255_v15  ;;  %v257_v17 = vsub.f32 %v245_v13, %v255_v15 }
 0x116   : > { %v258_v18 = vmul.f32 1.442695, %v256_v16  ;;  %v260_v19 = vmul.f32 1.442695, %v257_v17 }
 0x118   : > { %529 = vpow2.f32 %v258_v18 }
 0x119   : > { %531 = vpow2.f32 %v260_v19 }
 0x11e   : > { %v530_v23 = vpop.eup %529 }
 0x11f   : > { %v532_v25 = vpop.eup %531 }
 0x120   : > { %v262_v26 = vadd.f32 %v532_v25, %v530_v23 }
 0x122   : > { %263 = vadd.xlane.f32.xlu1 %v262_v26 }
 0x13b   : > { %187 = vperm.xlu1 %527, %v174_v27  }
 0x195   : > { %v264_v30 = vpop.xlane.xlu1 %263 }
 0x196   : > { %533 = vrcp.f32 %v264_v30 }
 0x197   : > { %535 = vpow2.f32 %v287_v0 }
 0x198   : > { %537 = vpow2.f32 %v289_v1 }
 0x19c   : > { %v534_v34 = vpop.eup %533 }
 0x19d   : > { %v266_v35 = vmul.f32 %v534_v34, %v530_v23  ;;  %v267_v36 = vmul.f32 %v534_v34, %v532_v25  ;;  %v536_v6 = vpop.eup %535 }
 0x19e   : > { %v538_v7 = vpop.eup %537  ;;  %v291_v8 = vrot.slane %v536_v6, 4 }
 0x19f   : > { %v309_v41 = vpack.c.bf16 %v266_v35, %v266_v35  ;;  %v310_v42 = vpack.c.bf16 %v267_v36, %v267_v36  ;;  %v297_v9 = vrot.slane %v538_v7, 4 }
 0x1a0   : > { %v292_v10 = vadd.f32 %v536_v6, %v291_v8 }
 0x1a1   : > { %318 = vmatpush.bf16.xpose.msra.mxu2 %v309_v41  ;;  %331 = vmatpush.bf16.xpose.msra.mxu3 %v310_v42  ;;  %v298_v11 = vadd.f32 %v538_v7, %v297_v9 }
 0x1a2   : > { %v293_v12 = vrot.slane %v292_v10, 2 }
 0x1a3   : > { %v299_v13 = vrot.slane %v298_v11, 2 }
 0x1a4   : > { %v294_v14 = vadd.f32 %v293_v12, %v292_v10 }
 0x1a5   : > { %v300_v15 = vadd.f32 %v299_v13, %v298_v11 }
 0x1a6   : > { %v295_v16 = vrot.slane %v294_v14, 1 }
 0x1a7   : > { %v301_v17 = vrot.slane %v300_v15, 1 }
 0x1a8   : > { %v296_v18 = vadd.f32 %v295_v16, %v294_v14 }
 0x1a9   : > { %v302_v19 = vadd.f32 %v301_v17, %v300_v15 }
 0x1aa   : > { %539 = vrcp.f32 %v296_v18 }
 0x1ab   : > { %541 = vrcp.f32 %v302_v19 }
 0x1ad   : > { %v188_v59 = vpop.permute.xlu1 %187 }
 0x1ae   : > { %v229_v62 = vadd.f32 %v228_v28, %v188_v59  ;;  %v247_v63 = vadd.f32 %v246_v29, %v188_v59 }
 0x1b0   : > { %v307_v4 = vpack.c.bf16 %v229_v62, %v229_v62  ;;  %v308_v5 = vpack.c.bf16 %v247_v63, %v247_v63  ;;  %v540_v20 = vpop.eup %539 }
 0x1b1   : > { %v542_v21 = vpop.eup %541  ;;  %v305_v22 = vmul.f32 %v540_v20, %v536_v6 }
 0x1b2   : > { %319 = vmatmul.bf16.vlgmr.msra.gmra.mxu2 %v307_v4  ;;  %332 = vmatmul.bf16.vlgmr.msra.gmra.mxu3 %v308_v5  ;;  %v306_v23 = vmul.f32 %v542_v21, %v538_v7 }
 0x1b3   : > { %v338_v24 = vpack.c.bf16 %v305_v22, %v305_v22 }
 0x1b4   : > { %v339_v25 = vpack.c.bf16 %v306_v23, %v306_v23 }
 0x1b5   : > { %v344_v26 = vsel %vm210_vm0, %v338_v24, 0 }
 0x1b6   : > { %356 = vmatpush.bf16.msrb.mxu2 %v344_v26  ;;  %v347_v27 = vsel %vm210_vm0, %v339_v25, 0 }
 0x1b7   : > { %369 = vmatpush.bf16.msrb.mxu3 %v347_v27 }
 0x235   : > { %v320_v28 = vpop.f32.mrf.mxu2  ;;  %v333_v29 = vpop.f32.mrf.mxu3 }
 0x236   : > { %v334_v30 = vadd.f32 %v333_v29, %v320_v28 }
 0x238   : > { %v337_v31 = vpack.c.bf16 %v334_v30, %v334_v30 }
 0x23a   : > { %476 = vmatmul.msk.bf16.vlgmr.msrb.gmra.mxu2 %vm203_vm1, %v337_v31  ;;  %477 = vmatmul.msk.bf16.vlgmr.msrb.gmra.mxu3 %vm203_vm1, %v337_v31 }
 0x23d   : > { %v322_v32 = vpop.f32.mrf.mxu2  ;;  %v335_v33 = vpop.f32.mrf.mxu3 }
 0x2bd   : > { %v358_v34 = vpop.f32.mrf.mxu2  ;;  %v371_v35 = vpop.f32.mrf.mxu3 }
 0x2be   : > { %v375_v36 = vadd.f32 %v358_v34, %v684_v2  ;;  %v376_v37 = vadd.f32 %v371_v35, %v686_v3 }
 0x2c0   : > { %vm377_vm3 = vcmp.ge.f32.partialorder %v375_v36, 0.0  ;;  %v379_v38 = vmul.f32 0.1, %v375_v36  ;;  %vm378_vm4 = vcmp.ge.f32.partialorder %v376_v37, 0.0  ;;  %v380_v39 = vmul.f32 0.1, %v376_v37 }
 0x2c2   : > { %v381_v40 = vsel %vm377_vm3, %v375_v36, %v379_v38  ;;  %v382_v41 = vsel %vm378_vm4, %v376_v37, %v380_v39 }
 0x2c3   : > { %383 = vst [vmem:[%s163_s27] sm:$0xff] %v381_v40 }
 0x2c4   : > { %384 = vst [vmem:[%s163_s27 + $0x8] sm:$0xff] %v382_v41 }
 0x2c5   : > { %v360_v42 = vpop.f32.mrf.mxu2  ;;  %v373_v43 = vpop.f32.mrf.mxu3 }
 0x2c6   : > { %570 = shalt.err (!%p567_p3)
}
 0x2c7   : > { %486 = dma.vmem_to_hbm [thread:$0]  (%p666_p5), %s400_s28, 256, %s402_s29, %s386_s16  }
 0x2c8 PF: > { %p492_p4 = scmp.ge.s32.totalorder %s605_s15, 2  ;;  %s413_s10 = sand.u32 1, %s593_s12  }
 0x2c9   : > { %s414_s11 = scalar_lea.sflag [#allocation3], %s413_s10 }
 0x2ca   : > { %p489_p7 = pnand %p492_p4, %p670_p6 }
 0x2cc   : > { %p490_p8 = pneg %p489_p7 }
 0x2ce   : > { %588 = dma.done.wait (%p490_p8), %s414_s11, 256  }
 0x2cf   : > { %590 = vsyncadd (%p490_p8), %s414_s11, 4294967040  ;;  %p13_p9 = scmp.ge.s32.totalorder %s653_s18, 4   ;;  %s754_s12 = smov %s597_s13 }
 0x2d0   : > { %s755_s13 = smov %s601_s14  ;;  %s756_s14 = smov %s664_s21 }
 0x2d1   : > { %s757_s15 = smov %s653_s18  ;;  %15 = sbr.rel (!%p13_p9) target bundleno = 3 (0x3), region = 67 }
 0x2d6   :  { %420 = vsyncpa [#allocation3], 1 }
 0x2d7   :  { %422 = vsyncpa [#allocation3 + $0x1], 1 }

</bundles_post_ra>
